<compile_context>
chip_gen: v5e
topology: v5e:2x2
jax: 0.10.0
libtpu: 0.0.40
codegen_flags: <defaults>
</compile_context>

<pallas_src>
import functools

import jax
import jax.numpy as jnp
from jax.experimental import pallas as pl
from jax.experimental.pallas import tpu as pltpu

NUM_LAYERS = 3
NUM_EMBEDDINGS = 32
EMBED_DIM = 32
HIDDEN = 128            # module default hidden_size -> lane-dense gates / outputs
PADDING_IDX = 0
PADDING_VALUE = 0.0


# -----------------------------------------------------------------------------
# Pallas kernel: one bidirectional LSTM layer, whole sequence, both directions
# interleaved in a single time loop (ILP on 1-TC chips).
# -----------------------------------------------------------------------------
def _bilstm_layer_kernel(maxlen_ref, len_ref, xg_f_ref, xg_b_ref,
                         whh_f_ref, whh_b_ref, y_ref, hn_ref, cn_ref,
                         h_f_sc, c_f_sc, h_b_sc, c_b_sc, *, hidden):
    """xg_{f,b}_ref : (T, Bp, 4H) bf16  precomputed x @ W_ih + (b_ih + b_hh)
       whh_{f,b}_ref: (H, 4H)    bf16  recurrent weights (transposed)
       y_ref        : (T, Bp, 2H) f32  fwd writes lanes [0:H), bwd writes [H:2H)
       hn_ref/cn_ref: (2, Bp, H)  f32  final hidden / cell state (0=fwd, 1=bwd)
       *_sc         : (Bp, H)     f32  VMEM scratch carrying the recurrent state."""
    H = hidden
    T = y_ref.shape[0]
    max_t = maxlen_ref[0]                 # max(src_lengths), from SMEM scalar prefetch
    lens = len_ref[...]                   # (Bp, 1) int32 — loaded once, hoisted

    h_f_sc[...] = jnp.zeros_like(h_f_sc)
    c_f_sc[...] = jnp.zeros_like(c_f_sc)
    h_b_sc[...] = jnp.zeros_like(h_b_sc)
    c_b_sc[...] = jnp.zeros_like(c_b_sc)

    def cell(xg_row, h, c, whh_ref):
        # bf16 operands into the MXU (native dtype on v5e/v6e/v7x), f32 accumulation,
        # f32 gate nonlinearities (v5e VPU/EUP have no bf16).
        gates = xg_row.astype(jnp.float32) + jnp.dot(
            h.astype(jnp.bfloat16), whh_ref[...],
            preferred_element_type=jnp.float32)                 # (Bp, 4H) f32
        i_g = jax.nn.sigmoid(gates[:, 0 * H:1 * H])
        f_g = jax.nn.sigmoid(gates[:, 1 * H:2 * H])
        g_g = jnp.tanh(gates[:, 2 * H:3 * H])
        o_g = jax.nn.sigmoid(gates[:, 3 * H:4 * H])
        c_new = f_g * c + i_g * g_g
        h_new = o_g * jnp.tanh(c_new)
        return h_new, c_new

    # TODO(synk): replace the per-step jnp.dot with pltpu.matmul_push_rhs (W_hh pinned
    # once before the loop) + matmul_acc_lhs / matmul_pop per step.
    @pl.loop(0, max_t)
    def _(s):
        t_f = s                           # forward walks t = s
        t_b = max_t - 1 - s               # reverse walks t = max_t-1-s

        # ---- forward direction ----
        h_f, c_f = h_f_sc[...], c_f_sc[...]
        hf_new, cf_new = cell(xg_f_ref[t_f], h_f, c_f, whh_f_ref)
        valid_f = t_f < lens              # (Bp, 1) packed-sequence length mask
        h_f_sc[...] = jnp.where(valid_f, hf_new, h_f)
        c_f_sc[...] = jnp.where(valid_f, cf_new, c_f)
        y_ref[pl.ds(t_f, 1), :, 0:H] = (
            jnp.where(valid_f, hf_new, 0.0)[None].astype(y_ref.dtype))

        # ---- reverse direction (independent of fwd -> co-scheduled for ILP) ----
        h_b, c_b = h_b_sc[...], c_b_sc[...]
        hb_new, cb_new = cell(xg_b_ref[t_b], h_b, c_b, whh_b_ref)
        valid_b = t_b < lens
        h_b_sc[...] = jnp.where(valid_b, hb_new, h_b)
        c_b_sc[...] = jnp.where(valid_b, cb_new, c_b)
        y_ref[pl.ds(t_b, 1), :, H:2 * H] = (
            jnp.where(valid_b, hb_new, 0.0)[None].astype(y_ref.dtype))

    # Only timesteps t >= max_t are never written by the loop; zero just that tail
    # (pad_packed_sequence padding_value = 0). Usually empty since max_t == T.
    @pl.loop(max_t, T)
    def _(t):
        y_ref[pl.ds(t, 1)] = jnp.zeros((1,) + y_ref.shape[1:], y_ref.dtype)

    hn_ref[0] = h_f_sc[...]
    hn_ref[1] = h_b_sc[...]
    cn_ref[0] = c_f_sc[...]
    cn_ref[1] = c_b_sc[...]


def bilstm_layer(xg_f, xg_b, whh_f, whh_b, lengths_col, max_len,
                 *, seqlen, bsz_p, hidden):
    """Returns y (T, Bp, 2H) f32, h_n (2, Bp, H), c_n (2, Bp, H)."""
    T, Bp, H = seqlen, bsz_p, hidden
    kern = functools.partial(_bilstm_layer_kernel, hidden=H)

    # Explicit VMEM budget (single grid step, everything resident once).
    bytes_needed = (2 * T * Bp * 4 * H * 2        # xg_f + xg_b (bf16)
                    + 2 * H * 4 * H * 2           # whh_f + whh_b (bf16)
                    + T * Bp * 2 * H * 4          # y (f32)
                    + 2 * 2 * Bp * H * 4          # hn, cn
                    + 4 * Bp * H * 4              # h/c scratch
                    + Bp * 4)                     # lengths
    vmem_limit = int(min(64 << 20, max(16 << 20, 2 * bytes_needed + (4 << 20))))

    y, h_n, c_n = pl.pallas_call(
        kern,
        grid_spec=pltpu.PrefetchScalarGridSpec(
            num_scalar_prefetch=1,                       # max_len -> SMEM
            grid=(1,),
            in_specs=[
                pl.BlockSpec((Bp, 1), lambda i, mx: (0, 0)),
                pl.BlockSpec((T, Bp, 4 * H), lambda i, mx: (0, 0, 0)),
                pl.BlockSpec((T, Bp, 4 * H), lambda i, mx: (0, 0, 0)),
                pl.BlockSpec((H, 4 * H), lambda i, mx: (0, 0)),
                pl.BlockSpec((H, 4 * H), lambda i, mx: (0, 0)),
            ],
            out_specs=[
                pl.BlockSpec((T, Bp, 2 * H), lambda i, mx: (0, 0, 0)),
                pl.BlockSpec((2, Bp, H), lambda i, mx: (0, 0, 0)),
                pl.BlockSpec((2, Bp, H), lambda i, mx: (0, 0, 0)),
            ],
            scratch_shapes=[pltpu.VMEM((Bp, H), jnp.float32),
                            pltpu.VMEM((Bp, H), jnp.float32),
                            pltpu.VMEM((Bp, H), jnp.float32),
                            pltpu.VMEM((Bp, H), jnp.float32)],
        ),
        out_shape=[
            jax.ShapeDtypeStruct((T, Bp, 2 * H), jnp.float32),
            jax.ShapeDtypeStruct((2, Bp, H), jnp.float32),
            jax.ShapeDtypeStruct((2, Bp, H), jnp.float32),
        ],
        compiler_params=pltpu.CompilerParams(
            dimension_semantics=("arbitrary",),
            vmem_limit_bytes=vmem_limit),
    )(max_len, lengths_col, xg_f, xg_b, whh_f, whh_b)
    return y, h_n, c_n


# -----------------------------------------------------------------------------
# Pallas kernel: masked_fill_(-inf) on padded positions + max over time.
# Tiled over T with a running-max accumulator (scales past scoped VMEM).
# -----------------------------------------------------------------------------
def _mask_max_kernel(x_ref, m_ref, xo_ref, s_ref):
    k = pl.program_id(0)
    x = x_ref[...]                        # (tc, Bp, D) f32
    pad = m_ref[...] > 0.0                # (tc, Bp, 1)
    xm = jnp.where(pad, -jnp.inf, x)      # masked_fill_(padding_mask, -inf)
    xo_ref[...] = xm.astype(xo_ref.dtype)

    @pl.when(k == 0)
    def _():
        s_ref[...] = jnp.full(s_ref.shape, -jnp.inf, s_ref.dtype)
    s_ref[...] = jnp.maximum(s_ref[...], jnp.max(xm, axis=0))   # running max over time


def masked_max(x, mask_f):
    T, Bp, D = x.shape
    tc = next(c for c in (256, 128, 64, 32, 16, 8, 4, 2, 1) if T % c == 0)
    nk = T // tc
    vmem_limit = int(min(64 << 20,
                         max(16 << 20, 4 * (2 * tc * Bp * (D + 1) + Bp * D) * 4)))
    x_masked, sentemb = pl.pallas_call(
        _mask_max_kernel,
        grid=(nk,),
        in_specs=[pl.BlockSpec((tc, Bp, D), lambda k: (k, 0, 0)),
                  pl.BlockSpec((tc, Bp, 1), lambda k: (k, 0, 0))],
        out_specs=[pl.BlockSpec((tc, Bp, D), lambda k: (k, 0, 0)),
                   pl.BlockSpec((Bp, D), lambda k: (0, 0))],      # accumulator block
        out_shape=[jax.ShapeDtypeStruct((T, Bp, D), jnp.float32),
                   jax.ShapeDtypeStruct((Bp, D), jnp.float32)],
        compiler_params=pltpu.CompilerParams(
            dimension_semantics=("arbitrary",),
            vmem_limit_bytes=vmem_limit),
    )(x, mask_f)
    return x_masked, sentemb


# -----------------------------------------------------------------------------
# Parameter init (deterministic, PyTorch-like). Weights stored pre-transposed and
# in bf16 (native MXU dtype); biases summed (b_ih + b_hh) and kept in f32.
# -----------------------------------------------------------------------------
def init_params(key):
    k_emb, key = jax.random.split(key)
    emb = jax.random.normal(k_emb, (NUM_EMBEDDINGS, EMBED_DIM), jnp.float32) * 0.1
    emb = emb.at[PADDING_IDX].set(0.0)             # padding_idx row is zero
    params = {"embed": emb, "lstm": []}
    bound = 1.0 / (HIDDEN ** 0.5)
    for layer in range(NUM_LAYERS):
        in_dim = EMBED_DIM if layer == 0 else 2 * HIDDEN
        w_ih_l, w_hh_l, b_l = [], [], []
        for _d in range(2):                        # 0 = forward, 1 = reverse
            key, k1, k2, k3, k4 = jax.random.split(key, 5)
            w_ih = jax.random.uniform(k1, (4 * HIDDEN, in_dim), jnp.float32, -bound, bound)
            w_hh = jax.random.uniform(k2, (4 * HIDDEN, HIDDEN), jnp.float32, -bound, bound)
            b_ih = jax.random.uniform(k3, (4 * HIDDEN,), jnp.float32, -bound, bound)
            b_hh = jax.random.uniform(k4, (4 * HIDDEN,), jnp.float32, -bound, bound)
            w_ih_l.append(w_ih.T.astype(jnp.bfloat16))             # (in_dim, 4H)
            w_hh_l.append(w_hh.T.astype(jnp.bfloat16))             # (H, 4H)
            b_l.append((b_ih + b_hh).reshape(1, 1, 4 * HIDDEN))    # (1, 1, 4H) f32
        params["lstm"].append({
            "w_ih_t": jnp.stack(w_ih_l, axis=0),   # (2, in_dim, 4H) bf16
            "w_hh_t": jnp.stack(w_hh_l, axis=0),   # (2, H, 4H) bf16
            "b": jnp.stack(b_l, axis=0),           # (2, 1, 1, 4H) f32
        })
    return params


# -----------------------------------------------------------------------------
# Full forward pass, mirroring NeuronLSTM.forward
# -----------------------------------------------------------------------------
def neuron_lstm_forward(params, src_tokens, src_lengths, *, has_pad=None):
    bsz, seqlen = src_tokens.shape

    # has_pad: pass it statically to avoid any host sync; if omitted, it is computed
    # from the *inputs only* BEFORE any recurrent kernel is dispatched, so the sync
    # does not serialize behind the LSTM kernels.
    if has_pad is None:
        has_pad = bool(jax.device_get(jnp.any(src_tokens == PADDING_IDX)))

    # Pad the batch to a multiple of 8 sublanes -> dense (8,128) tiles everywhere.
    Bp = ((bsz + 7) // 8) * 8
    pad_b = Bp - bsz

    # Embedding lookup (tiny gather -> plain-JAX glue), then (T, B, E), batch-padded.
    x = jnp.take(params["embed"], src_tokens, axis=0)           # (bsz, seqlen, E)
    x = jnp.transpose(x, (1, 0, 2)).astype(jnp.float32)         # (seqlen, bsz, E)
    x = jnp.pad(x, ((0, 0), (0, pad_b), (0, 0)))                # (T, Bp, E)

    lengths = src_lengths.astype(jnp.int32)
    lengths_p = jnp.pad(lengths, (0, pad_b))                    # pad rows: length 0
    lengths_col = lengths_p.reshape(Bp, 1)
    max_len = jnp.max(lengths).astype(jnp.int32).reshape(1)

    final_h, final_c = [], []
    inp = x
    for layer in range(NUM_LAYERS):
        lp = params["lstm"][layer]
        # Hoisted input projection + bias, per direction, off the serial recurrent
        # path; bf16 operands, f32 accumulation, stored as bf16 for the kernel DMA.
        inp_bf = inp.astype(jnp.bfloat16)
        xg_f = (jnp.einsum("tbi,ij->tbj", inp_bf, lp["w_ih_t"][0],
                           preferred_element_type=jnp.float32)
                + lp["b"][0]).astype(jnp.bfloat16)               # (T, Bp, 4H)
        xg_b = (jnp.einsum("tbi,ij->tbj", inp_bf, lp["w_ih_t"][1],
                           preferred_element_type=jnp.float32)
                + lp["b"][1]).astype(jnp.bfloat16)               # (T, Bp, 4H)

        y, h_n, c_n = bilstm_layer(xg_f, xg_b, lp["w_hh_t"][0], lp["w_hh_t"][1],
                                   lengths_col, max_len,
                                   seqlen=seqlen, bsz_p=Bp, hidden=HIDDEN)
        inp = y                                                  # fused (T, Bp, 2H)

        # Literal spec semantics: torch.cat([h_fwd, h_bwd], dim=0).view(1, bsz, 2H)
        # flattens all fwd rows first, then all bwd rows; the reshape of the stacked
        # (2, bsz, H) array reproduces exactly that (deliberately NOT transposed).
        final_h.append(h_n[:, :bsz, :].reshape(1, bsz, 2 * HIDDEN))
        final_c.append(c_n[:, :bsz, :].reshape(1, bsz, 2 * HIDDEN))

    x_out = inp                                                  # (T, Bp, 2H)
    final_hiddens = jnp.concatenate(final_h, axis=0)             # (L, bsz, 2H)
    final_cells = jnp.concatenate(final_c, axis=0)               # (L, bsz, 2H)

    encoder_padding_mask = (src_tokens == PADDING_IDX).T         # (seqlen, bsz) bool
    mask_p = jnp.pad(encoder_padding_mask, ((0, 0), (0, pad_b)),
                     constant_values=True)                       # pad rows -> masked
    mask_f = mask_p.astype(jnp.float32)[:, :, None]              # (T, Bp, 1)

    # Unconditional masking is semantically identical (all-False mask => unchanged).
    x_masked_p, sentemb_p = masked_max(x_out, mask_f)
    x_masked = x_masked_p[:, :bsz, :]
    sentemb = sentemb_p[:bsz, :]

    output = [sentemb, x_masked, final_hiddens, final_cells]
    if has_pad:
        output.append(encoder_padding_mask)
    return output


if __name__ == "__main__":
    root = jax.random.PRNGKey(0)
    k_params, k_tok = jax.random.split(root)
    params = init_params(k_params)

    bsz, seqlen = 2, 8
    src_lengths = jnp.array([8, 5], dtype=jnp.int32)             # sorted descending
    tokens = jax.random.randint(k_tok, (bsz, seqlen), 1, NUM_EMBEDDINGS, dtype=jnp.int32)
    pos = jnp.arange(seqlen)[None, :]
    src_tokens = jnp.where(pos < src_lengths[:, None], tokens, PADDING_IDX)

    out = neuron_lstm_forward(params, src_tokens, src_lengths, has_pad=True)
    out = jax.block_until_ready(out)

    sentemb, x, fh, fc = out[0], out[1], out[2], out[3]
    assert sentemb.shape == (bsz, 2 * HIDDEN)
    assert x.shape == (seqlen, bsz, 2 * HIDDEN)
    assert fh.shape == (NUM_LAYERS, bsz, 2 * HIDDEN)
    assert fc.shape == (NUM_LAYERS, bsz, 2 * HIDDEN)
    assert bool(jnp.isfinite(sentemb).all())
    if len(out) == 5:
        assert out[4].shape == (seqlen, bsz)
    print("KERNEL_OK")
</pallas_src>

<mosaic_0001>
module attributes {stable_mosaic.version = 11 : i64} {
  func.func @_bilstm_layer_kernel(%arg0: i32, %arg1: memref<1xi32, #tpu.memory_space<smem>>, %arg2: memref<8x1xi32, #tpu.memory_space<vmem>>, %arg3: memref<8x8x512xbf16, #tpu.memory_space<vmem>>, %arg4: memref<8x8x512xbf16, #tpu.memory_space<vmem>>, %arg5: memref<128x512xbf16, #tpu.memory_space<vmem>>, %arg6: memref<128x512xbf16, #tpu.memory_space<vmem>>, %arg7: memref<8x8x256xf32, #tpu.memory_space<vmem>>, %arg8: memref<2x8x128xf32, #tpu.memory_space<vmem>>, %arg9: memref<2x8x128xf32, #tpu.memory_space<vmem>>, %arg10: memref<8x128xf32, #tpu.memory_space<vmem>>, %arg11: memref<8x128xf32, #tpu.memory_space<vmem>>, %arg12: memref<8x128xf32, #tpu.memory_space<vmem>>, %arg13: memref<8x128xf32, #tpu.memory_space<vmem>>) attributes {dimension_semantics = [#tpu.dimension_semantics<arbitrary>], iteration_bounds = array<i64: 1>, scalar_prefetch = 1 : i64, scratch_operands = 4 : i64, tpu.core_type = #tpu.core_type<tc>, window_params = [{pipeline_mode = #tpu.pipeline_mode<synchronous>, transform_indices = @transform_0, window_bounds = array<i64: 8, 1>}, {pipeline_mode = #tpu.pipeline_mode<synchronous>, transform_indices = @transform_1, window_bounds = array<i64: 8, 8, 512>}, {pipeline_mode = #tpu.pipeline_mode<synchronous>, transform_indices = @transform_2, window_bounds = array<i64: 8, 8, 512>}, {pipeline_mode = #tpu.pipeline_mode<synchronous>, transform_indices = @transform_3, window_bounds = array<i64: 128, 512>}, {pipeline_mode = #tpu.pipeline_mode<synchronous>, transform_indices = @transform_4, window_bounds = array<i64: 128, 512>}, {pipeline_mode = #tpu.pipeline_mode<synchronous>, transform_indices = @transform_5, window_bounds = array<i64: 8, 8, 256>}, {pipeline_mode = #tpu.pipeline_mode<synchronous>, transform_indices = @transform_6, window_bounds = array<i64: 2, 8, 128>}, {pipeline_mode = #tpu.pipeline_mode<synchronous>, transform_indices = @transform_7, window_bounds = array<i64: 2, 8, 128>}]} {
    %c0 = arith.constant 0 : index
    %0 = memref.load %arg1[%c0] : memref<1xi32, #tpu.memory_space<smem>>
    %c0_0 = arith.constant 0 : index
    %c0_1 = arith.constant 0 : index
    %1 = vector.load %arg2[%c0_0, %c0_1] : memref<8x1xi32, #tpu.memory_space<vmem>>, vector<8x1xi32>
    %cst = arith.constant 0.000000e+00 : f32
    %2 = vector.broadcast %cst : f32 to vector<8x128xf32>
    %c0_2 = arith.constant 0 : index
    %c0_3 = arith.constant 0 : index
    %3 = vector.load %arg10[%c0_2, %c0_3] : memref<8x128xf32, #tpu.memory_space<vmem>>, vector<8x128xf32>
    tpu.vector_store %arg10[%c0_2, %c0_3], %2 {strides = array<i32>} : memref<8x128xf32, #tpu.memory_space<vmem>>, vector<8x128xf32>,
    %cst_4 = arith.constant 0.000000e+00 : f32
    %4 = vector.broadcast %cst_4 : f32 to vector<8x128xf32>
    %c0_5 = arith.constant 0 : index
    %c0_6 = arith.constant 0 : index
    %5 = vector.load %arg11[%c0_5, %c0_6] : memref<8x128xf32, #tpu.memory_space<vmem>>, vector<8x128xf32>
    tpu.vector_store %arg11[%c0_5, %c0_6], %4 {strides = array<i32>} : memref<8x128xf32, #tpu.memory_space<vmem>>, vector<8x128xf32>,
    %cst_7 = arith.constant 0.000000e+00 : f32
    %6 = vector.broadcast %cst_7 : f32 to vector<8x128xf32>
    %c0_8 = arith.constant 0 : index
    %c0_9 = arith.constant 0 : index
    %7 = vector.load %arg12[%c0_8, %c0_9] : memref<8x128xf32, #tpu.memory_space<vmem>>, vector<8x128xf32>
    tpu.vector_store %arg12[%c0_8, %c0_9], %6 {strides = array<i32>} : memref<8x128xf32, #tpu.memory_space<vmem>>, vector<8x128xf32>,
    %cst_10 = arith.constant 0.000000e+00 : f32
    %8 = vector.broadcast %cst_10 : f32 to vector<8x128xf32>
    %c0_11 = arith.constant 0 : index
    %c0_12 = arith.constant 0 : index
    %9 = vector.load %arg13[%c0_11, %c0_12] : memref<8x128xf32, #tpu.memory_space<vmem>>, vector<8x128xf32>
    tpu.vector_store %arg13[%c0_11, %c0_12], %8 {strides = array<i32>} : memref<8x128xf32, #tpu.memory_space<vmem>>, vector<8x128xf32>,
    %c0_i32 = arith.constant 0 : i32
    %10 = arith.subi %0, %c0_i32 : i32
    %c1_i32 = arith.constant 1 : i32
    %c1_i32_13 = arith.constant 1 : i32
    %11 = arith.subi %c1_i32, %c1_i32_13 : i32
    %12 = arith.addi %10, %11 : i32
    %c1_i32_14 = arith.constant 1 : i32
    %13 = arith.divsi %12, %c1_i32_14 : i32
    %c1_i32_15 = arith.constant 1 : i32
    %c0_i32_16 = arith.constant 0 : i32
    %c0_i32_17 = arith.constant 0 : i32
    %14 = arith.subi %13, %c0_i32_17 : i32
    %15 = arith.addi %c0_i32_17, %14 : i32
    %c1_i32_18 = arith.constant 1 : i32
    scf.for %arg14 = %c0_i32_17 to %15 step %c1_i32_18  : i32 {
      %38 = arith.muli %arg14, %c1_i32_15 : i32
      %39 = arith.addi %c0_i32_16, %38 : i32
      %c1_i32_44 = arith.constant 1 : i32
      %40 = arith.subi %0, %c1_i32_44 : i32
      %41 = arith.subi %40, %39 : i32
      %c0_45 = arith.constant 0 : index
      %c0_46 = arith.constant 0 : index
      %42 = vector.load %arg10[%c0_45, %c0_46] : memref<8x128xf32, #tpu.memory_space<vmem>>, vector<8x128xf32>
      %c0_47 = arith.constant 0 : index
      %c0_48 = arith.constant 0 : index
      %43 = vector.load %arg11[%c0_47, %c0_48] : memref<8x128xf32, #tpu.memory_space<vmem>>, vector<8x128xf32>
      %44 = arith.index_cast %39 : i32 to index
      %c0_49 = arith.constant 0 : index
      %c0_50 = arith.constant 0 : index
      %45 = vector.load %arg3[%44, %c0_49, %c0_50] : memref<8x8x512xbf16, #tpu.memory_space<vmem>>, vector<1x8x512xbf16>
      %46 = vector.shape_cast %45 : vector<1x8x512xbf16> to vector<8x512xbf16>
      %47 = arith.extf %46 : vector<8x512xbf16> to vector<8x512xf32>
      %48 = arith.truncf %42 : vector<8x128xf32> to vector<8x128xbf16>
      %c0_51 = arith.constant 0 : index
      %c0_52 = arith.constant 0 : index
      %49 = vector.load %arg5[%c0_51, %c0_52] : memref<128x512xbf16, #tpu.memory_space<vmem>>, vector<128x512xbf16>
      %cst_53 = arith.constant dense<0.000000e+00> : vector<8x512xf32>
      %50 = tpu.matmul %48, %49, %cst_53 {dimension_numbers = #tpu.dot_dimension_numbers<[1], [0], [0], [1], [0, 0, 1, 1], [], []>} : vector<8x128xbf16>, vector<128x512xbf16>, vector<8x512xf32> -> vector<8x512xf32>
      %51 = arith.addf %47, %50 : vector<8x512xf32>
      %52 = vector.extract_strided_slice %51 {offsets = [0, 0], sizes = [8, 128], strides = [1, 1]} : vector<8x512xf32> to vector<8x128xf32>
      %53 = arith.negf %52 : vector<8x128xf32>
      %54 = math.exp %53 : vector<8x128xf32>
      %cst_54 = arith.constant 1.000000e+00 : f32
      %55 = vector.broadcast %cst_54 : f32 to vector<8x128xf32>
      %56 = arith.addf %55, %54 : vector<8x128xf32>
      %57 = arith.divf %55, %56 : vector<8x128xf32>
      %58 = vector.extract_strided_slice %51 {offsets = [0, 128], sizes = [8, 128], strides = [1, 1]} : vector<8x512xf32> to vector<8x128xf32>
      %59 = arith.negf %58 : vector<8x128xf32>
      %60 = math.exp %59 : vector<8x128xf32>
      %cst_55 = arith.constant 1.000000e+00 : f32
      %61 = vector.broadcast %cst_55 : f32 to vector<8x128xf32>
      %62 = arith.addf %61, %60 : vector<8x128xf32>
      %63 = arith.divf %61, %62 : vector<8x128xf32>
      %64 = vector.extract_strided_slice %51 {offsets = [0, 256], sizes = [8, 128], strides = [1, 1]} : vector<8x512xf32> to vector<8x128xf32>
      %65 = math.tanh %64 : vector<8x128xf32>
      %66 = vector.extract_strided_slice %51 {offsets = [0, 384], sizes = [8, 128], strides = [1, 1]} : vector<8x512xf32> to vector<8x128xf32>
      %67 = arith.negf %66 : vector<8x128xf32>
      %68 = math.exp %67 : vector<8x128xf32>
      %cst_56 = arith.constant 1.000000e+00 : f32
      %69 = vector.broadcast %cst_56 : f32 to vector<8x128xf32>
      %70 = arith.addf %69, %68 : vector<8x128xf32>
      %71 = arith.divf %69, %70 : vector<8x128xf32>
      %72 = arith.mulf %63, %43 : vector<8x128xf32>
      %73 = arith.mulf %57, %65 : vector<8x128xf32>
      %74 = arith.addf %72, %73 : vector<8x128xf32>
      %75 = math.tanh %74 : vector<8x128xf32>
      %76 = arith.mulf %71, %75 : vector<8x128xf32>
      %77 = vector.broadcast %39 : i32 to vector<8x1xi32>
      %78 = arith.cmpi slt, %77, %1 : vector<8x1xi32>
      %79 = vector.shape_cast %78 : vector<8x1xi1> to vector<8x1xi1>
      %80 = vector.broadcast %79 : vector<8x1xi1> to vector<8x128xi1>
      %81 = arith.select %80, %76, %42 : vector<8x128xi1>, vector<8x128xf32>
      %c0_57 = arith.constant 0 : index
      %c0_58 = arith.constant 0 : index
      %82 = vector.load %arg10[%c0_57, %c0_58] : memref<8x128xf32, #tpu.memory_space<vmem>>, vector<8x128xf32>
      tpu.vector_store %arg10[%c0_57, %c0_58], %81 {strides = array<i32>} : memref<8x128xf32, #tpu.memory_space<vmem>>, vector<8x128xf32>,
      %83 = vector.shape_cast %78 : vector<8x1xi1> to vector<8x1xi1>
      %84 = vector.broadcast %83 : vector<8x1xi1> to vector<8x128xi1>
      %85 = arith.select %84, %74, %43 : vector<8x128xi1>, vector<8x128xf32>
      %c0_59 = arith.constant 0 : index
      %c0_60 = arith.constant 0 : index
      %86 = vector.load %arg11[%c0_59, %c0_60] : memref<8x128xf32, #tpu.memory_space<vmem>>, vector<8x128xf32>
      tpu.vector_store %arg11[%c0_59, %c0_60], %85 {strides = array<i32>} : memref<8x128xf32, #tpu.memory_space<vmem>>, vector<8x128xf32>,
      %cst_61 = arith.constant 0.000000e+00 : f32
      %87 = vector.shape_cast %78 : vector<8x1xi1> to vector<8x1xi1>
      %88 = vector.broadcast %87 : vector<8x1xi1> to vector<8x128xi1>
      %89 = vector.broadcast %cst_61 : f32 to vector<8x128xf32>
      %90 = arith.select %88, %76, %89 : vector<8x128xi1>, vector<8x128xf32>
      %91 = vector.shape_cast %90 : vector<8x128xf32> to vector<1x8x128xf32>
      %92 = arith.index_cast %39 : i32 to index
      %c0_62 = arith.constant 0 : index
      %c0_63 = arith.constant 0 : index
      %93 = vector.load %arg7[%92, %c0_62, %c0_63] : memref<8x8x256xf32, #tpu.memory_space<vmem>>, vector<1x8x128xf32>
      tpu.vector_store %arg7[%92, %c0_62, %c0_63], %91 {strides = array<i32>} : memref<8x8x256xf32, #tpu.memory_space<vmem>>, vector<1x8x128xf32>,
      %c0_64 = arith.constant 0 : index
      %c0_65 = arith.constant 0 : index
      %94 = vector.load %arg12[%c0_64, %c0_65] : memref<8x128xf32, #tpu.memory_space<vmem>>, vector<8x128xf32>
      %c0_66 = arith.constant 0 : index
      %c0_67 = arith.constant 0 : index
      %95 = vector.load %arg13[%c0_66, %c0_67] : memref<8x128xf32, #tpu.memory_space<vmem>>, vector<8x128xf32>
      %96 = arith.index_cast %41 : i32 to index
      %c0_68 = arith.constant 0 : index
      %c0_69 = arith.constant 0 : index
      %97 = vector.load %arg4[%96, %c0_68, %c0_69] : memref<8x8x512xbf16, #tpu.memory_space<vmem>>, vector<1x8x512xbf16>
      %98 = vector.shape_cast %97 : vector<1x8x512xbf16> to vector<8x512xbf16>
      %99 = arith.extf %98 : vector<8x512xbf16> to vector<8x512xf32>
      %100 = arith.truncf %94 : vector<8x128xf32> to vector<8x128xbf16>
      %c0_70 = arith.constant 0 : index
      %c0_71 = arith.constant 0 : index
      %101 = vector.load %arg6[%c0_70, %c0_71] : memref<128x512xbf16, #tpu.memory_space<vmem>>, vector<128x512xbf16>
      %cst_72 = arith.constant dense<0.000000e+00> : vector<8x512xf32>
      %102 = tpu.matmul %100, %101, %cst_72 {dimension_numbers = #tpu.dot_dimension_numbers<[1], [0], [0], [1], [0, 0, 1, 1], [], []>} : vector<8x128xbf16>, vector<128x512xbf16>, vector<8x512xf32> -> vector<8x512xf32>
      %103 = arith.addf %99, %102 : vector<8x512xf32>
      %104 = vector.extract_strided_slice %103 {offsets = [0, 0], sizes = [8, 128], strides = [1, 1]} : vector<8x512xf32> to vector<8x128xf32>
      %105 = arith.negf %104 : vector<8x128xf32>
      %106 = math.exp %105 : vector<8x128xf32>
      %cst_73 = arith.constant 1.000000e+00 : f32
      %107 = vector.broadcast %cst_73 : f32 to vector<8x128xf32>
      %108 = arith.addf %107, %106 : vector<8x128xf32>
      %109 = arith.divf %107, %108 : vector<8x128xf32>
      %110 = vector.extract_strided_slice %103 {offsets = [0, 128], sizes = [8, 128], strides = [1, 1]} : vector<8x512xf32> to vector<8x128xf32>
      %111 = arith.negf %110 : vector<8x128xf32>
      %112 = math.exp %111 : vector<8x128xf32>
      %cst_74 = arith.constant 1.000000e+00 : f32
      %113 = vector.broadcast %cst_74 : f32 to vector<8x128xf32>
      %114 = arith.addf %113, %112 : vector<8x128xf32>
      %115 = arith.divf %113, %114 : vector<8x128xf32>
      %116 = vector.extract_strided_slice %103 {offsets = [0, 256], sizes = [8, 128], strides = [1, 1]} : vector<8x512xf32> to vector<8x128xf32>
      %117 = math.tanh %116 : vector<8x128xf32>
      %118 = vector.extract_strided_slice %103 {offsets = [0, 384], sizes = [8, 128], strides = [1, 1]} : vector<8x512xf32> to vector<8x128xf32>
      %119 = arith.negf %118 : vector<8x128xf32>
      %120 = math.exp %119 : vector<8x128xf32>
      %cst_75 = arith.constant 1.000000e+00 : f32
      %121 = vector.broadcast %cst_75 : f32 to vector<8x128xf32>
      %122 = arith.addf %121, %120 : vector<8x128xf32>
      %123 = arith.divf %121, %122 : vector<8x128xf32>
      %124 = arith.mulf %115, %95 : vector<8x128xf32>
      %125 = arith.mulf %109, %117 : vector<8x128xf32>
      %126 = arith.addf %124, %125 : vector<8x128xf32>
      %127 = math.tanh %126 : vector<8x128xf32>
      %128 = arith.mulf %123, %127 : vector<8x128xf32>
      %129 = vector.broadcast %41 : i32 to vector<8x1xi32>
      %130 = arith.cmpi slt, %129, %1 : vector<8x1xi32>
      %131 = vector.shape_cast %130 : vector<8x1xi1> to vector<8x1xi1>
      %132 = vector.broadcast %131 : vector<8x1xi1> to vector<8x128xi1>
      %133 = arith.select %132, %128, %94 : vector<8x128xi1>, vector<8x128xf32>
      %c0_76 = arith.constant 0 : index
      %c0_77 = arith.constant 0 : index
      %134 = vector.load %arg12[%c0_76, %c0_77] : memref<8x128xf32, #tpu.memory_space<vmem>>, vector<8x128xf32>
      tpu.vector_store %arg12[%c0_76, %c0_77], %133 {strides = array<i32>} : memref<8x128xf32, #tpu.memory_space<vmem>>, vector<8x128xf32>,
      %135 = vector.shape_cast %130 : vector<8x1xi1> to vector<8x1xi1>
      %136 = vector.broadcast %135 : vector<8x1xi1> to vector<8x128xi1>
      %137 = arith.select %136, %126, %95 : vector<8x128xi1>, vector<8x128xf32>
      %c0_78 = arith.constant 0 : index
      %c0_79 = arith.constant 0 : index
      %138 = vector.load %arg13[%c0_78, %c0_79] : memref<8x128xf32, #tpu.memory_space<vmem>>, vector<8x128xf32>
      tpu.vector_store %arg13[%c0_78, %c0_79], %137 {strides = array<i32>} : memref<8x128xf32, #tpu.memory_space<vmem>>, vector<8x128xf32>,
      %cst_80 = arith.constant 0.000000e+00 : f32
      %139 = vector.shape_cast %130 : vector<8x1xi1> to vector<8x1xi1>
      %140 = vector.broadcast %139 : vector<8x1xi1> to vector<8x128xi1>
      %141 = vector.broadcast %cst_80 : f32 to vector<8x128xf32>
      %142 = arith.select %140, %128, %141 : vector<8x128xi1>, vector<8x128xf32>
      %143 = vector.shape_cast %142 : vector<8x128xf32> to vector<1x8x128xf32>
      %144 = arith.index_cast %41 : i32 to index
      %c0_81 = arith.constant 0 : index
      %c128 = arith.constant 128 : index
      %145 = vector.load %arg7[%144, %c0_81, %c128] : memref<8x8x256xf32, #tpu.memory_space<vmem>>, vector<1x8x128xf32>
      tpu.vector_store %arg7[%144, %c0_81, %c128], %143 {strides = array<i32>} : memref<8x8x256xf32, #tpu.memory_space<vmem>>, vector<1x8x128xf32>,
    }
    %c8_i32 = arith.constant 8 : i32
    %16 = arith.subi %c8_i32, %0 : i32
    %c1_i32_19 = arith.constant 1 : i32
    %c1_i32_20 = arith.constant 1 : i32
    %17 = arith.subi %c1_i32_19, %c1_i32_20 : i32
    %18 = arith.addi %16, %17 : i32
    %c1_i32_21 = arith.constant 1 : i32
    %19 = arith.divsi %18, %c1_i32_21 : i32
    %c1_i32_22 = arith.constant 1 : i32
    %c0_i32_23 = arith.constant 0 : i32
    %20 = arith.subi %19, %c0_i32_23 : i32
    %21 = arith.addi %c0_i32_23, %20 : i32
    %c1_i32_24 = arith.constant 1 : i32
    scf.for %arg14 = %c0_i32_23 to %21 step %c1_i32_24  : i32 {
      %38 = arith.muli %arg14, %c1_i32_22 : i32
      %39 = arith.addi %0, %38 : i32
      %cst_44 = arith.constant 0.000000e+00 : f32
      %40 = vector.broadcast %cst_44 : f32 to vector<1x8x256xf32>
      %41 = arith.index_cast %39 : i32 to index
      %c0_45 = arith.constant 0 : index
      %c0_46 = arith.constant 0 : index
      %42 = vector.load %arg7[%41, %c0_45, %c0_46] : memref<8x8x256xf32, #tpu.memory_space<vmem>>, vector<1x8x256xf32>
      tpu.vector_store %arg7[%41, %c0_45, %c0_46], %40 {strides = array<i32>} : memref<8x8x256xf32, #tpu.memory_space<vmem>>, vector<1x8x256xf32>,
    }
    %c0_25 = arith.constant 0 : index
    %c0_26 = arith.constant 0 : index
    %22 = vector.load %arg10[%c0_25, %c0_26] : memref<8x128xf32, #tpu.memory_space<vmem>>, vector<8x128xf32>
    %c0_27 = arith.constant 0 : index
    %c0_28 = arith.constant 0 : index
    %c0_29 = arith.constant 0 : index
    %23 = vector.load %arg8[%c0_27, %c0_28, %c0_29] : memref<2x8x128xf32, #tpu.memory_space<vmem>>, vector<1x8x128xf32>
    %24 = vector.shape_cast %23 : vector<1x8x128xf32> to vector<8x128xf32>
    %25 = vector.shape_cast %22 : vector<8x128xf32> to vector<1x8x128xf32>
    tpu.vector_store %arg8[%c0_27, %c0_28, %c0_29], %25 {strides = array<i32>} : memref<2x8x128xf32, #tpu.memory_space<vmem>>, vector<1x8x128xf32>,
    %c0_30 = arith.constant 0 : index
    %c0_31 = arith.constant 0 : index
    %26 = vector.load %arg12[%c0_30, %c0_31] : memref<8x128xf32, #tpu.memory_space<vmem>>, vector<8x128xf32>
    %c1 = arith.constant 1 : index
    %c0_32 = arith.constant 0 : index
    %c0_33 = arith.constant 0 : index
    %27 = vector.load %arg8[%c1, %c0_32, %c0_33] : memref<2x8x128xf32, #tpu.memory_space<vmem>>, vector<1x8x128xf32>
    %28 = vector.shape_cast %27 : vector<1x8x128xf32> to vector<8x128xf32>
    %29 = vector.shape_cast %26 : vector<8x128xf32> to vector<1x8x128xf32>
    tpu.vector_store %arg8[%c1, %c0_32, %c0_33], %29 {strides = array<i32>} : memref<2x8x128xf32, #tpu.memory_space<vmem>>, vector<1x8x128xf32>,
    %c0_34 = arith.constant 0 : index
    %c0_35 = arith.constant 0 : index
    %30 = vector.load %arg11[%c0_34, %c0_35] : memref<8x128xf32, #tpu.memory_space<vmem>>, vector<8x128xf32>
    %c0_36 = arith.constant 0 : index
    %c0_37 = arith.constant 0 : index
    %c0_38 = arith.constant 0 : index
    %31 = vector.load %arg9[%c0_36, %c0_37, %c0_38] : memref<2x8x128xf32, #tpu.memory_space<vmem>>, vector<1x8x128xf32>
    %32 = vector.shape_cast %31 : vector<1x8x128xf32> to vector<8x128xf32>
    %33 = vector.shape_cast %30 : vector<8x128xf32> to vector<1x8x128xf32>
    tpu.vector_store %arg9[%c0_36, %c0_37, %c0_38], %33 {strides = array<i32>} : memref<2x8x128xf32, #tpu.memory_space<vmem>>, vector<1x8x128xf32>,
    %c0_39 = arith.constant 0 : index
    %c0_40 = arith.constant 0 : index
    %34 = vector.load %arg13[%c0_39, %c0_40] : memref<8x128xf32, #tpu.memory_space<vmem>>, vector<8x128xf32>
    %c1_41 = arith.constant 1 : index
    %c0_42 = arith.constant 0 : index
    %c0_43 = arith.constant 0 : index
    %35 = vector.load %arg9[%c1_41, %c0_42, %c0_43] : memref<2x8x128xf32, #tpu.memory_space<vmem>>, vector<1x8x128xf32>
    %36 = vector.shape_cast %35 : vector<1x8x128xf32> to vector<8x128xf32>
    %37 = vector.shape_cast %34 : vector<8x128xf32> to vector<1x8x128xf32>
    tpu.vector_store %arg9[%c1_41, %c0_42, %c0_43], %37 {strides = array<i32>} : memref<2x8x128xf32, #tpu.memory_space<vmem>>, vector<1x8x128xf32>,
    return
  }
  func.func @transform_0(%arg0: i32, %arg1: memref<1xi32, #tpu.memory_space<smem>>) -> (i32, i32) {
    %c0_i32 = arith.constant 0 : i32
    %c0_i32_0 = arith.constant 0 : i32
    %c0_i32_1 = arith.constant 0 : i32
    return %c0_i32, %c0_i32_0 : i32, i32
  }
  func.func @transform_1(%arg0: i32, %arg1: memref<1xi32, #tpu.memory_space<smem>>) -> (i32, i32, i32) {
    %c0_i32 = arith.constant 0 : i32
    %c0_i32_0 = arith.constant 0 : i32
    %c0_i32_1 = arith.constant 0 : i32
    %c0_i32_2 = arith.constant 0 : i32
    return %c0_i32, %c0_i32_0, %c0_i32_1 : i32, i32, i32
  }
  func.func @transform_2(%arg0: i32, %arg1: memref<1xi32, #tpu.memory_space<smem>>) -> (i32, i32, i32) {
    %c0_i32 = arith.constant 0 : i32
    %c0_i32_0 = arith.constant 0 : i32
    %c0_i32_1 = arith.constant 0 : i32
    %c0_i32_2 = arith.constant 0 : i32
    return %c0_i32, %c0_i32_0, %c0_i32_1 : i32, i32, i32
  }
  func.func @transform_3(%arg0: i32, %arg1: memref<1xi32, #tpu.memory_space<smem>>) -> (i32, i32) {
    %c0_i32 = arith.constant 0 : i32
    %c0_i32_0 = arith.constant 0 : i32
    %c0_i32_1 = arith.constant 0 : i32
    return %c0_i32, %c0_i32_0 : i32, i32
  }
  func.func @transform_4(%arg0: i32, %arg1: memref<1xi32, #tpu.memory_space<smem>>) -> (i32, i32) {
    %c0_i32 = arith.constant 0 : i32
    %c0_i32_0 = arith.constant 0 : i32
    %c0_i32_1 = arith.constant 0 : i32
    return %c0_i32, %c0_i32_0 : i32, i32
  }
  func.func @transform_5(%arg0: i32, %arg1: memref<1xi32, #tpu.memory_space<smem>>) -> (i32, i32, i32) {
    %c0_i32 = arith.constant 0 : i32
    %c0_i32_0 = arith.constant 0 : i32
    %c0_i32_1 = arith.constant 0 : i32
    %c0_i32_2 = arith.constant 0 : i32
    return %c0_i32, %c0_i32_0, %c0_i32_1 : i32, i32, i32
  }
  func.func @transform_6(%arg0: i32, %arg1: memref<1xi32, #tpu.memory_space<smem>>) -> (i32, i32, i32) {
    %c0_i32 = arith.constant 0 : i32
    %c0_i32_0 = arith.constant 0 : i32
    %c0_i32_1 = arith.constant 0 : i32
    %c0_i32_2 = arith.constant 0 : i32
    return %c0_i32, %c0_i32_0, %c0_i32_1 : i32, i32, i32
  }
  func.func @transform_7(%arg0: i32, %arg1: memref<1xi32, #tpu.memory_space<smem>>) -> (i32, i32, i32) {
    %c0_i32 = arith.constant 0 : i32
    %c0_i32_0 = arith.constant 0 : i32
    %c0_i32_1 = arith.constant 0 : i32
    %c0_i32_2 = arith.constant 0 : i32
    return %c0_i32, %c0_i32_0, %c0_i32_1 : i32, i32, i32
  }
}

</mosaic_0001>

<bundles_post_ra>
// kernel: tpu_custom_call.1
= control target key start
LH: loop header
LB: loop body
LE: loop exit
PB: predicated region body
PF: predicated region fallthrough
CT: control target
= control target key end

     0   :  { %15 = vsyncpa [#allocation9], 0  ;;  %s1674_s0 = inlined_call_operand.<no memory space> [shape: s32[1], index: 0, kind: input, shape index: {}]   ;;  %s1675_s1 = inlined_call_operand.vmem [shape: s32[8,1], index: 1, kind: input, shape index: {}]   ;;  %s1676_s2 = inlined_call_operand.hbm [shape: bf16[8,8,512], index: 2, kind: input, shape index: {}]   ;;  %s1677_s3 = inlined_call_operand.hbm [shape: bf16[8,8,512], index: 3, kind: input, shape index: {}]   ;;  %s1678_s4 = inlined_call_operand.hbm [shape: bf16[128,512], index: 4, kind: input, shape index: {}]   ;;  %s1679_s5 = inlined_call_operand.hbm [shape: bf16[128,512], index: 5, kind: input, shape index: {}]   ;;  %s1680_s6 = inlined_call_operand.hbm [shape: f32[8,8,256], index: 6, kind: output, shape index: {0}]   ;;  %s1681_s7 = inlined_call_operand.hbm [shape: f32[2,8,128], index: 7, kind: output, shape index: {1}]   ;;  %s1682_s8 = inlined_call_operand.hbm [shape: f32[2,8,128], index: 8, kind: output, shape index: {2}]  }
   0x1   :  { %16 = vsyncpa [#allocation12], 0 }
   0x2   :  { %17 = vsyncpa [#allocation15], 0 }
   0x3   :  { %18 = vsyncpa [#allocation10], 0 }
   0x4   :  { %19 = vsyncpa [#allocation18], 0  ;;  %s39_s29 = sshll.u32 %s1677_s3, 4  ;;  %s1483_s30 = smov [#allocation11]   ;;  %s40_s29 = int_to_ptr.hbm [resolvable:$true] %s39_s29 }
   0x5   :  { %s41_s9 = sshll.u32 %s1483_s30, 4  ;;  %s26_s12 = sshll.u32 %s1676_s2, 4  ;;  %s42_s9 = int_to_ptr.vmem [resolvable:$true] %s41_s9  ;;  %s27_s12 = int_to_ptr.hbm [resolvable:$true] %s26_s12 }
   0x6   :  { %s1484_s13 = smov 256   ;;  %s1485_s14 = smov 16  }
   0x7   :  { %47 = dma.hbm_to_vmem [thread:$0]  %s40_s29, 2048, %s42_s9, [#allocation12], %s1484_s13, %s1484_s13, %s1485_s14  }
   0x8   :  { %s1486_s15 = smov [#allocation8]   ;;  %s52_s3 = sshll.u32 %s1678_s4, 4  ;;  %s53_s3 = int_to_ptr.hbm [resolvable:$true] %s52_s3 }
   0x9   :  { %s28_s16 = sshll.u32 %s1486_s15, 4  ;;  %s65_s20 = sshll.u32 %s1679_s5, 4  ;;  %s29_s16 = int_to_ptr.vmem [resolvable:$true] %s28_s16  ;;  %s66_s20 = int_to_ptr.hbm [resolvable:$true] %s65_s20 }
   0xa   :  { %34 = dma.hbm_to_vmem [thread:$0]  %s27_s12, 2048, %s29_s16, [#allocation9], %s1484_s13, %s1484_s13, %s1485_s14  }
   0xb   :  { %s1487_s21 = smov [#allocation13]   ;;  %s1488_s23 = smov [#allocation14]  }
   0xc   :  { %s54_s22 = sshll.u32 %s1487_s21, 4  ;;  %s67_s4 = sshll.u32 %s1488_s23, 4  ;;  %s55_s22 = int_to_ptr.vmem [resolvable:$true] %s54_s22  ;;  %s68_s4 = int_to_ptr.vmem [resolvable:$true] %s67_s4 }
   0xd   :  { %60 = dma.hbm_to_vmem [thread:$0]  %s53_s3, 4096, %s55_s22, [#allocation12], %s1484_s13, %s1484_s13, %s1485_s14  }
   0xe   :  { %73 = dma.hbm_to_vmem [thread:$0]  %s66_s20, 4096, %s68_s4, [#allocation15], %s1484_s13, %s1484_s13, %s1485_s14  }
   0xf   :  { %1465 = dma.done.wait [#allocation9], 2048  }
  0x10   :  { %1466 = vsyncadd [#allocation9], 4294965248 }
  0x11   :  { %1467 = dma.done.wait [#allocation12], 6144  }
  0x12   :  { %1468 = vsyncadd [#allocation12], 4294961152 }
  0x13   :  { %1469 = dma.done.wait [#allocation15], 4096  }
  0x14   :  { %1470 = vsyncadd [#allocation15], 4294963200  ;;  %v1489_v0 = vmov 0.0   ;;  %v1569_v1 = vld [vmem:[%s1675_s1] sm:$0xff]  ;;  %p882_p0 = scmp.le.s32.totalorder %s1674_s0, 0 }
  0x15   :  { %92 = vst [vmem:[#allocation2] sm:$0xff] %v1489_v0  ;;  %s1574_s27 = smov (!%p882_p0), 0  }
  0x16   :  { %93 = vst [vmem:[#allocation3] sm:$0xff] %v1489_v0  ;;  %874 = sbr.rel (%p882_p0) target bundleno = 266 (0x10a), region = 87 }
  0x17   :  { %94 = vst [vmem:[#allocation4] sm:$0xff] %v1489_v0 }
  0x18   :  { %95 = vst [vmem:[#allocation5] sm:$0xff] %v1489_v0 }
  0x1b LB: > { %v1000_v2 = vld [vmem:[#allocation13 + $0xe0] sm:$0xf]  ;;  %v1188_v3 = vld [vmem:[#allocation13 + $0xec] sm:$0xf0]  ;;  %v1186_v4 = vld [vmem:[#allocation13 + $0xe4] sm:$0xf]  ;;  %s1477_s27 = sphi %s1574_s27, %s99_s27  }
  0x1c   : > { %v1001_v5 = vor.u32 %v1188_v3, %v1000_v2  ;;  %v1002_v6 = vld [vmem:[#allocation13 + $0xf0] sm:$0xf0]  ;;  %v1187_v7 = vld [vmem:[#allocation13 + $0xec] sm:$0xf]  ;;  %v1010_v8 = vld [vmem:[#allocation13 + $0xf8] sm:$0xf0] }
  0x1d   : > { %v1005_v9 = vor.u32 %v1186_v4, %v1002_v6  ;;  %v1013_v10 = vor.u32 %v1187_v7, %v1010_v8  ;;  %v984_v11 = vld [vmem:[#allocation13 + $0xc0] sm:$0xf]  ;;  %v1184_v12 = vld [vmem:[#allocation13 + $0xcc] sm:$0xf0]  ;;  %v1182_v13 = vld [vmem:[#allocation13 + $0xc4] sm:$0xf] }
  0x1e   : > { %308 = vmatpush.bf16.msra.mxu0 %v1001_v5  ;;  %v985_v14 = vor.u32 %v1184_v12, %v984_v11  ;;  %v986_v15 = vld [vmem:[#allocation13 + $0xd0] sm:$0xf0]  ;;  %v1183_v16 = vld [vmem:[#allocation13 + $0xcc] sm:$0xf]  ;;  %v994_v17 = vld [vmem:[#allocation13 + $0xd8] sm:$0xf0] }
  0x1f   : > { %321 = vmatpush.bf16.msra.mxu1 %v1005_v9  ;;  %347 = vmatpush.bf16.msra.mxu3 %v1013_v10  ;;  %v989_v18 = vor.u32 %v1182_v13, %v986_v15  ;;  %v997_v19 = vor.u32 %v1183_v16, %v994_v17  ;;  %v1008_v20 = vld [vmem:[#allocation13 + $0xe8] sm:$0xf]  ;;  %v1189_v21 = vld [vmem:[#allocation13 + $0xf4] sm:$0xf0]  ;;  %v968_v22 = vld [vmem:[#allocation13 + $0xa0] sm:$0xf] }
  0x20   : > { %v1009_v23 = vor.u32 %v1189_v21, %v1008_v20  ;;  %v1180_v24 = vld [vmem:[#allocation13 + $0xac] sm:$0xf0]  ;;  %v1178_v25 = vld [vmem:[#allocation13 + $0xa4] sm:$0xf]  ;;  %v970_v26 = vld [vmem:[#allocation13 + $0xb0] sm:$0xf0] }
  0x21   : > { %v1179_v27 = vld [vmem:[#allocation13 + $0xac] sm:$0xf]  ;;  %v978_v28 = vld [vmem:[#allocation13 + $0xb8] sm:$0xf0]  ;;  %v992_v29 = vld [vmem:[#allocation13 + $0xc8] sm:$0xf]  ;;  %v969_v30 = vor.u32 %v1180_v24, %v968_v22  ;;  %v973_v34 = vor.u32 %v1178_v25, %v970_v26 }
  0x22   : > { %309 = vmatpush.bf16.msra.mxu0 %v985_v14  ;;  %334 = vmatpush.bf16.msra.mxu2 %v1009_v23  ;;  %v1185_v31 = vld [vmem:[#allocation13 + $0xd4] sm:$0xf0]  ;;  %v952_v32 = vld [vmem:[#allocation13 + $0x80] sm:$0xf]  ;;  %v1176_v33 = vld [vmem:[#allocation13 + $0x8c] sm:$0xf0]  ;;  %v981_v35 = vor.u32 %v1179_v27, %v978_v28 }
  0x23   : > { %322 = vmatpush.bf16.msra.mxu1 %v989_v18  ;;  %348 = vmatpush.bf16.msra.mxu3 %v997_v19  ;;  %v993_v36 = vor.u32 %v1185_v31, %v992_v29  ;;  %v1174_v37 = vld [vmem:[#allocation13 + $0x84] sm:$0xf]  ;;  %v954_v38 = vld [vmem:[#allocation13 + $0x90] sm:$0xf0]  ;;  %v1175_v39 = vld [vmem:[#allocation13 + $0x8c] sm:$0xf]  ;;  %v953_v43 = vor.u32 %v1176_v33, %v952_v32 }
  0x24   : > { %v962_v40 = vld [vmem:[#allocation13 + $0x98] sm:$0xf0]  ;;  %v976_v41 = vld [vmem:[#allocation13 + $0xa8] sm:$0xf]  ;;  %v1181_v42 = vld [vmem:[#allocation13 + $0xb4] sm:$0xf0]  ;;  %v957_v47 = vor.u32 %v1174_v37, %v954_v38 }
  0x25   : > { %v977_v44 = vor.u32 %v1181_v42, %v976_v41  ;;  %v936_v45 = vld [vmem:[#allocation13 + $0x60] sm:$0xf]  ;;  %v1172_v46 = vld [vmem:[#allocation13 + $0x6c] sm:$0xf0]  ;;  %v965_v48 = vor.u32 %v1175_v39, %v962_v40  ;;  %v1170_v49 = vld [vmem:[#allocation13 + $0x64] sm:$0xf] }
  0x26   : > { %310 = vmatpush.bf16.msra.mxu0 %v969_v30  ;;  %335 = vmatpush.bf16.msra.mxu2 %v993_v36  ;;  %v960_v50 = vld [vmem:[#allocation13 + $0x88] sm:$0xf]  ;;  %v1177_v51 = vld [vmem:[#allocation13 + $0x94] sm:$0xf0]  ;;  %v938_v52 = vld [vmem:[#allocation13 + $0x70] sm:$0xf0]  ;;  %v937_v55 = vor.u32 %v1172_v46, %v936_v45 }
  0x27   : > { %323 = vmatpush.bf16.msra.mxu1 %v973_v34  ;;  %349 = vmatpush.bf16.msra.mxu3 %v981_v35  ;;  %v1171_v53 = vld [vmem:[#allocation13 + $0x6c] sm:$0xf]  ;;  %v946_v54 = vld [vmem:[#allocation13 + $0x78] sm:$0xf0]  ;;  %v961_v56 = vor.u32 %v1177_v51, %v960_v50  ;;  %v920_v57 = vld [vmem:[#allocation13 + $0x40] sm:$0xf]  ;;  %v941_v59 = vor.u32 %v1170_v49, %v938_v52 }
  0x28   : > { %v1168_v58 = vld [vmem:[#allocation13 + $0x4c] sm:$0xf0]  ;;  %v949_v60 = vor.u32 %v1171_v53, %v946_v54  ;;  %v1166_v61 = vld [vmem:[#allocation13 + $0x44] sm:$0xf]  ;;  %v944_v62 = vld [vmem:[#allocation13 + $0x68] sm:$0xf] }
  0x29   : > { %v1173_v63 = vld [vmem:[#allocation13 + $0x74] sm:$0xf0]  ;;  %v922_v0 = vld [vmem:[#allocation13 + $0x50] sm:$0xf0]  ;;  %v1167_v2 = vld [vmem:[#allocation13 + $0x4c] sm:$0xf]  ;;  %v921_v4 = vor.u32 %v1168_v58, %v920_v57 }
  0x2a   : > { %311 = vmatpush.bf16.msra.mxu0 %v953_v43  ;;  %336 = vmatpush.bf16.msra.mxu2 %v977_v44  ;;  %v930_v3 = vld [vmem:[#allocation13 + $0x58] sm:$0xf0]  ;;  %v945_v5 = vor.u32 %v1173_v63, %v944_v62  ;;  %v904_v6 = vld [vmem:[#allocation13 + $0x20] sm:$0xf]  ;;  %v1164_v7 = vld [vmem:[#allocation13 + $0x2c] sm:$0xf0]  ;;  %v925_v8 = vor.u32 %v1166_v61, %v922_v0 }
  0x2b   : > { %324 = vmatpush.bf16.msra.mxu1 %v957_v47  ;;  %350 = vmatpush.bf16.msra.mxu3 %v965_v48  ;;  %v933_v9 = vor.u32 %v1167_v2, %v930_v3  ;;  %v1162_v10 = vld [vmem:[#allocation13 + $0x24] sm:$0xf]  ;;  %v928_v11 = vld [vmem:[#allocation13 + $0x48] sm:$0xf]  ;;  %v1169_v12 = vld [vmem:[#allocation13 + $0x54] sm:$0xf0]  ;;  %v905_v16 = vor.u32 %v1164_v7, %v904_v6 }
  0x2c   : > { %v906_v13 = vld [vmem:[#allocation13 + $0x30] sm:$0xf0]  ;;  %v1163_v14 = vld [vmem:[#allocation13 + $0x2c] sm:$0xf]  ;;  %v914_v15 = vld [vmem:[#allocation13 + $0x38] sm:$0xf0]  ;;  %v929_v17 = vor.u32 %v1169_v12, %v928_v11 }
  0x2d   : > { %v888_v18 = vld [vmem:[#allocation13] sm:$0xf]  ;;  %v1160_v19 = vld [vmem:[#allocation13 + $0xc] sm:$0xf0]  ;;  %v1158_v20 = vld [vmem:[#allocation13 + $0x4] sm:$0xf]  ;;  %v909_v21 = vor.u32 %v1162_v10, %v906_v13  ;;  %v917_v22 = vor.u32 %v1163_v14, %v914_v15 }
  0x2e   : > { %312 = vmatpush.bf16.msra.mxu0 %v937_v55  ;;  %337 = vmatpush.bf16.msra.mxu2 %v961_v56  ;;  %v890_v23 = vld [vmem:[#allocation13 + $0x10] sm:$0xf0]  ;;  %v912_v24 = vld [vmem:[#allocation13 + $0x28] sm:$0xf]  ;;  %v1165_v25 = vld [vmem:[#allocation13 + $0x34] sm:$0xf0]  ;;  %v889_v32 = vor.u32 %v1160_v19, %v888_v18 }
  0x2f   : > { %325 = vmatpush.bf16.msra.mxu1 %v941_v59  ;;  %351 = vmatpush.bf16.msra.mxu3 %v949_v60  ;;  %v1159_v26 = vld [vmem:[#allocation13 + $0xc] sm:$0xf]  ;;  %v898_v27 = vld [vmem:[#allocation13 + $0x18] sm:$0xf0]  ;;  %v1135_v28 = vld [vmem:[#allocation14 + $0xe0] sm:$0xf]  ;;  %v913_v36 = vor.u32 %v1165_v25, %v912_v24  ;;  %v893_v37 = vor.u32 %v1158_v20, %v890_v23 }
  0x30   : > { %v1222_v29 = vld [vmem:[#allocation14 + $0xec] sm:$0xf0]  ;;  %v1220_v30 = vld [vmem:[#allocation14 + $0xe4] sm:$0xf]  ;;  %v1137_v31 = vld [vmem:[#allocation14 + $0xf0] sm:$0xf0]  ;;  %v901_v38 = vor.u32 %v1159_v26, %v898_v27 }
  0x31   : > { %v1221_v33 = vld [vmem:[#allocation14 + $0xec] sm:$0xf]  ;;  %v1145_v34 = vld [vmem:[#allocation14 + $0xf8] sm:$0xf0]  ;;  %v1579_v35 = vld [vmem:[#allocation2] sm:$0xff]  ;;  %v1136_v41 = vor.u32 %v1222_v29, %v1135_v28  ;;  %v1140_v42 = vor.u32 %v1220_v30, %v1137_v31  ;;  %s883_s29 = sadd.s32 4294967295, %s1674_s0 }
  0x32   : > { %313 = vmatpush.bf16.msra.mxu0 %v921_v4  ;;  %338 = vmatpush.bf16.msra.mxu2 %v945_v5  ;;  %v896_v39 = vld [vmem:[#allocation13 + $0x8] sm:$0xf]  ;;  %v1161_v40 = vld [vmem:[#allocation13 + $0x14] sm:$0xf0]  ;;  %v1119_v43 = vld [vmem:[#allocation14 + $0xc0] sm:$0xf]  ;;  %v1148_v46 = vor.u32 %v1221_v33, %v1145_v34  ;;  %v115_v47 = vpack.c.bf16 %v1579_v35, %v1579_v35  ;;  %s1593_s30 = ssub.s32 %s883_s29, %s1477_s27 }
  0x33   : > { %326 = vmatpush.bf16.msra.mxu1 %v925_v8  ;;  %352 = vmatpush.bf16.msra.mxu3 %v933_v9  ;;  %v1143_v44 = vld [vmem:[#allocation14 + $0xe8] sm:$0xf]  ;;  %v1223_v45 = vld [vmem:[#allocation14 + $0xf4] sm:$0xf0]  ;;  %v1218_v48 = vld [vmem:[#allocation14 + $0xcc] sm:$0xf0]  ;;  %v897_v53 = vor.u32 %v1161_v40, %v896_v39  ;;  %v427_v9 = vstv %s1477_s27  ;;  %v766_v31 = vstv %s1593_s30 }
  0x34   : > { %v1216_v49 = vld [vmem:[#allocation14 + $0xc4] sm:$0xf]  ;;  %v1121_v50 = vld [vmem:[#allocation14 + $0xd0] sm:$0xf0]  ;;  %v1217_v51 = vld [vmem:[#allocation14 + $0xcc] sm:$0xf]  ;;  %v1144_v54 = vor.u32 %v1223_v45, %v1143_v44  ;;  %v1120_v55 = vor.u32 %v1218_v48, %v1119_v43  ;;  %vm1588_vm0 = vcmp.lt.s32.totalorder %v427_v9, %v1569_v1  ;;  %vm767_vm1 = vcmp.lt.s32.totalorder %v766_v31, %v1569_v1 }
  0x35   : > { %v1129_v52 = vld [vmem:[#allocation14 + $0xd8] sm:$0xf0]  ;;  %v1124_v56 = vor.u32 %v1216_v49, %v1121_v50  ;;  %v1103_v57 = vld [vmem:[#allocation14 + $0xa0] sm:$0xf]  ;;  %v1127_v58 = vld [vmem:[#allocation14 + $0xc8] sm:$0xf] }
  0x36   : > { %314 = vmatpush.bf16.msra.mxu0 %v905_v16  ;;  %339 = vmatpush.bf16.msra.mxu2 %v929_v17  ;;  %v1219_v59 = vld [vmem:[#allocation14 + $0xd4] sm:$0xf0]  ;;  %v1132_v60 = vor.u32 %v1217_v51, %v1129_v52  ;;  %v1214_v61 = vld [vmem:[#allocation14 + $0xac] sm:$0xf0]  ;;  %v1212_v62 = vld [vmem:[#allocation14 + $0xa4] sm:$0xf] }
  0x37   : > { %327 = vmatpush.bf16.msra.mxu1 %v909_v21  ;;  %353 = vmatpush.bf16.msra.mxu3 %v917_v22  ;;  %v1105_v63 = vld [vmem:[#allocation14 + $0xb0] sm:$0xf0]  ;;  %v1213_v0 = vld [vmem:[#allocation14 + $0xac] sm:$0xf]  ;;  %v1113_v2 = vld [vmem:[#allocation14 + $0xb8] sm:$0xf0]  ;;  %v1128_v3 = vor.u32 %v1219_v59, %v1127_v58  ;;  %v1104_v4 = vor.u32 %v1214_v61, %v1103_v57 }
  0x38   : > { %v1108_v5 = vor.u32 %v1212_v62, %v1105_v63  ;;  %v1087_v6 = vld [vmem:[#allocation14 + $0x80] sm:$0xf]  ;;  %v1111_v7 = vld [vmem:[#allocation14 + $0xa8] sm:$0xf]  ;;  %v1215_v8 = vld [vmem:[#allocation14 + $0xb4] sm:$0xf0]  ;;  %v1116_v10 = vor.u32 %v1213_v0, %v1113_v2 }
  0x39   : > { %v1210_v11 = vld [vmem:[#allocation14 + $0x8c] sm:$0xf0]  ;;  %v1208_v12 = vld [vmem:[#allocation14 + $0x84] sm:$0xf]  ;;  %v1089_v13 = vld [vmem:[#allocation14 + $0x90] sm:$0xf0]  ;;  %v1112_v16 = vor.u32 %v1215_v8, %v1111_v7 }
  0x3a   : > { %315 = vmatpush.bf16.msra.mxu0 %v889_v32  ;;  %340 = vmatpush.bf16.msra.mxu2 %v913_v36  ;;  %v1209_v14 = vld [vmem:[#allocation14 + $0x8c] sm:$0xf]  ;;  %v1097_v15 = vld [vmem:[#allocation14 + $0x98] sm:$0xf0]  ;;  %v1071_v17 = vld [vmem:[#allocation14 + $0x60] sm:$0xf]  ;;  %v1088_v19 = vor.u32 %v1210_v11, %v1087_v6  ;;  %v1092_v20 = vor.u32 %v1208_v12, %v1089_v13 }
  0x3b   : > { %328 = vmatpush.bf16.msra.mxu1 %v893_v37  ;;  %354 = vmatpush.bf16.msra.mxu3 %v901_v38  ;;  %v1095_v21 = vld [vmem:[#allocation14 + $0x88] sm:$0xf]  ;;  %v1211_v22 = vld [vmem:[#allocation14 + $0x94] sm:$0xf0]  ;;  %v1100_v23 = vor.u32 %v1209_v14, %v1097_v15  ;;  %v1206_v24 = vld [vmem:[#allocation14 + $0x6c] sm:$0xf0] }
  0x3c   : > { %v1204_v25 = vld [vmem:[#allocation14 + $0x64] sm:$0xf]  ;;  %v1073_v26 = vld [vmem:[#allocation14 + $0x70] sm:$0xf0]  ;;  %v1490_v27 = vmov 0   ;;  %v1096_v32 = vor.u32 %v1211_v22, %v1095_v21  ;;  %v1072_v33 = vor.u32 %v1206_v24, %v1071_v17  ;;  %s1157_s9 = sshll.u32 %s1477_s27, 4 }
  0x3d   : > { %316 = vmatmul.bf16.vlgmr.msra.gmra.mxu0 %v115_v47  ;;  %1256 = vset.pattern.permute.xlu0 %v1490_v27  ;;  %v1205_v28 = vld [vmem:[#allocation14 + $0x6c] sm:$0xf]  ;;  %v1081_v29 = vld [vmem:[#allocation14 + $0x78] sm:$0xf0]  ;;  %v429_v30 = vsel %vm1588_vm0, 1, %v1490_v27  ;;  %v1076_v34 = vor.u32 %v1204_v25, %v1073_v26  ;;  %v768_v51 = vsel %vm767_vm1, 1, %v1490_v27 }
  0x3e   : > { %647 = vmatpush.bf16.msrb.mxu0 %v1136_v41  ;;  %329 = vmatmul.bf16.vlgmr.msra.gmra.mxu1 %v115_v47  ;;  %v1055_v36 = vld [vmem:[#allocation14 + $0x40] sm:$0xf]  ;;  %v1079_v37 = vld [vmem:[#allocation14 + $0x68] sm:$0xf]  ;;  %v1207_v38 = vld [vmem:[#allocation14 + $0x74] sm:$0xf0]  ;;  %v1084_v39 = vor.u32 %v1205_v28, %v1081_v29 }
  0x3f   : > { %660 = vmatpush.bf16.msrb.mxu1 %v1140_v42  ;;  %686 = vmatpush.bf16.msrb.mxu3 %v1148_v46  ;;  %v1202_v40 = vld [vmem:[#allocation14 + $0x4c] sm:$0xf0]  ;;  %v1200_v41 = vld [vmem:[#allocation14 + $0x44] sm:$0xf]  ;;  %v1057_v42 = vld [vmem:[#allocation14 + $0x50] sm:$0xf0]  ;;  %v1080_v45 = vor.u32 %v1207_v38, %v1079_v37 }
  0x40   : > { %341 = vmatpush.bf16.msra.mxu2 %v897_v53  ;;  %355 = vmatmul.bf16.vlgmr.msra.gmra.mxu3 %v115_v47  ;;  %v1201_v43 = vld [vmem:[#allocation14 + $0x4c] sm:$0xf]  ;;  %v1065_v44 = vld [vmem:[#allocation14 + $0x58] sm:$0xf0]  ;;  %v1039_v46 = vld [vmem:[#allocation14 + $0x20] sm:$0xf]  ;;  %v1060_v48 = vor.u32 %v1200_v41, %v1057_v42 }
  0x41   : > { %431 = vperm.xlu0 %1256, %v429_v30   ;;  %v1063_v49 = vld [vmem:[#allocation14 + $0x48] sm:$0xf]  ;;  %v1203_v50 = vld [vmem:[#allocation14 + $0x54] sm:$0xf0]  ;;  %v1068_v52 = vor.u32 %v1201_v43, %v1065_v44  ;;  %v1198_v53 = vld [vmem:[#allocation14 + $0x2c] sm:$0xf0] }
  0x42   : > { %648 = vmatpush.bf16.msrb.mxu0 %v1120_v55  ;;  %v1041_v55 = vld [vmem:[#allocation14 + $0x30] sm:$0xf0]  ;;  %v1049_v57 = vld [vmem:[#allocation14 + $0x38] sm:$0xf0]  ;;  %v1064_v58 = vor.u32 %v1203_v50, %v1063_v49  ;;  %v1040_v59 = vor.u32 %v1198_v53, %v1039_v46  ;;  %v1023_v61 = vld [vmem:[#allocation14] sm:$0xf] }
  0x43   : > { %661 = vmatpush.bf16.msrb.mxu1 %v1124_v56  ;;  %687 = vmatpush.bf16.msrb.mxu3 %v1132_v60  ;;  %v1197_v56 = vld [vmem:[#allocation14 + $0x2c] sm:$0xf]  ;;  %v1047_v62 = vld [vmem:[#allocation14 + $0x28] sm:$0xf]  ;;  %v1199_v63 = vld [vmem:[#allocation14 + $0x34] sm:$0xf0] }
  0x44   : > { %673 = vmatpush.bf16.msrb.mxu2 %v1144_v54  ;;  %v1196_v54 = vld [vmem:[#allocation14 + $0x24] sm:$0xf]  ;;  %v1052_v0 = vor.u32 %v1197_v56, %v1049_v57  ;;  %v1194_v2 = vld [vmem:[#allocation14 + $0xc] sm:$0xf0]  ;;  %v1033_v6 = vld [vmem:[#allocation14 + $0x18] sm:$0xf0]  ;;  %v1048_v7 = vor.u32 %v1199_v63, %v1047_v62 }
  0x45   : > { %342 = vmatmul.bf16.vlgmr.msra.gmra.mxu2 %v115_v47  ;;  %v1056_v47 = vor.u32 %v1202_v40, %v1055_v36  ;;  %v1044_v60 = vor.u32 %v1196_v54, %v1041_v55  ;;  %v1024_v8 = vor.u32 %v1194_v2, %v1023_v61  ;;  %v1031_v12 = vld [vmem:[#allocation14 + $0x8] sm:$0xf]  ;;  %v1195_v13 = vld [vmem:[#allocation14 + $0x14] sm:$0xf0]  ;;  %s108_s10 = scalar_lea.vmem [#allocation8], %s1157_s9  ;;  %s1191_s11 = sshll.u32 %s1593_s30, 4 }
  0x46   : > { %649 = vmatpush.bf16.msrb.mxu0 %v1104_v4  ;;  %v1025_v4 = vld [vmem:[#allocation14 + $0x10] sm:$0xf0]  ;;  %v1032_v15 = vor.u32 %v1195_v13, %v1031_v12  ;;  %s1612_s12 = scalar_lea.vmem [#allocation11], %s1191_s11  ;;  %s441_s15 = scalar_lea.vmem [#allocation16], %s1157_s9 }
  0x47   : > { %662 = vmatpush.bf16.msrb.mxu1 %v1108_v5  ;;  %688 = vmatpush.bf16.msrb.mxu3 %v1116_v10  ;;  %v1193_v5 = vld [vmem:[#allocation14 + $0xc] sm:$0xf]  ;;  %v1599_v10 = vld [vmem:[#allocation4] sm:$0xff]  ;;  %s780_s16 = scalar_lea.vmem [#allocation16], %s1191_s11  ;;  %s99_s27 = sadd.s32 1, %s1477_s27  }
  0x48   : > { %674 = vmatpush.bf16.msrb.mxu2 %v1128_v3  ;;  %v1192_v3 = vld [vmem:[#allocation14 + $0x4] sm:$0xf]  ;;  %v1036_v11 = vor.u32 %v1193_v5, %v1033_v6  ;;  %v454_v14 = vpack.c.bf16 %v1599_v10, %v1599_v10  ;;  %p98_p1 = scmp.ge.s32.totalorder %s99_s27, %s1674_s0 }
  0x49   : > { %770 = vperm.xlu0 %1256, %v768_v51   ;;  %v1028_v9 = vor.u32 %v1192_v3, %v1025_v4 }
  0x4a   : > { %650 = vmatpush.bf16.msrb.mxu0 %v1088_v19 }
  0x4b   : > { %663 = vmatpush.bf16.msrb.mxu1 %v1092_v20  ;;  %689 = vmatpush.bf16.msrb.mxu3 %v1100_v23  ;;  %v110_v23 = vld [vmem:[%s108_s10 + $0x8] sm:$0xff] }
  0x4c   : > { %675 = vmatpush.bf16.msrb.mxu2 %v1112_v16  ;;  %v109_v16 = vld [vmem:[%s108_s10] sm:$0xff]  ;;  %v114_v26 = vunpack.c.h.bf16 %v110_v23  ;;  %v113_v38 = vunpack.c.l.bf16 %v110_v23 }
  0x4d   : > { %v111_v17 = vunpack.c.l.bf16 %v109_v16  ;;  %v112_v18 = vunpack.c.h.bf16 %v109_v16 }
  0x4e   : > { %651 = vmatpush.bf16.msrb.mxu0 %v1072_v33 }
  0x4f   : > { %664 = vmatpush.bf16.msrb.mxu1 %v1076_v34  ;;  %690 = vmatpush.bf16.msrb.mxu3 %v1084_v39 }
  0x50   : > { %676 = vmatpush.bf16.msrb.mxu2 %v1096_v32 }
  0x52   : > { %652 = vmatpush.bf16.msrb.mxu0 %v1056_v47 }
  0x53   : > { %665 = vmatpush.bf16.msrb.mxu1 %v1060_v48  ;;  %691 = vmatpush.bf16.msrb.mxu3 %v1068_v52  ;;  %v448_v52 = vld [vmem:[%s1612_s12] sm:$0xff] }
  0x54   : > { %677 = vmatpush.bf16.msrb.mxu2 %v1080_v45  ;;  %v450_v61 = vunpack.c.l.bf16 %v448_v52  ;;  %v451_v62 = vunpack.c.h.bf16 %v448_v52 }
  0x56   : > { %653 = vmatpush.bf16.msrb.mxu0 %v1040_v59 }
  0x57   : > { %666 = vmatpush.bf16.msrb.mxu1 %v1044_v60  ;;  %692 = vmatpush.bf16.msrb.mxu3 %v1052_v0 }
  0x58   : > { %678 = vmatpush.bf16.msrb.mxu2 %v1064_v58 }
  0x5a   : > { %654 = vmatpush.bf16.msrb.mxu0 %v1024_v8 }
  0x5b   : > { %667 = vmatpush.bf16.msrb.mxu1 %v1028_v9  ;;  %693 = vmatpush.bf16.msrb.mxu3 %v1036_v11  ;;  %v105_v9 = vld [vmem:[#allocation3] sm:$0xff] }
  0x5c   : > { %679 = vmatpush.bf16.msrb.mxu2 %v1048_v7 }
  0x5d   : > { %655 = vmatmul.bf16.vlgmr.msrb.gmra.mxu0 %v454_v14 }
  0x5e   : > { %668 = vmatmul.bf16.vlgmr.msrb.gmra.mxu1 %v454_v14  ;;  %694 = vmatmul.bf16.vlgmr.msrb.gmra.mxu3 %v454_v14 }
  0x60   : > { %680 = vmatpush.bf16.msrb.mxu2 %v1032_v15 }
  0x63   : > { %681 = vmatmul.bf16.vlgmr.msrb.gmra.mxu2 %v454_v14 }
  0xb3   : > { %v432_v16 = vpop.permute.xlu0 %431 }
  0xb4   : > { %vm433_vm12 = vcmp.eq.s32.totalorder %v432_v16, 1 }
  0xba   : > { %v317_v19 = vpop.f32.mrf.mxu0 }
  0xbb   : > { %v360_v20 = vadd.f32 %v317_v19, %v111_v17  ;;  %v330_v21 = vpop.f32.mrf.mxu1  ;;  %v449_v17 = vld [vmem:[%s1612_s12 + $0x8] sm:$0xff] }
  0xbc   : > { %v361_v22 = vadd.f32 %v330_v21, %v112_v18 }
  0xbd   : > { %v1014_v24 = vmul.f32 -1.442695, %v360_v20 }
  0xbe   : > { %v1015_v25 = vmul.f32 -1.442695, %v361_v22 }
  0xbf   : > { %1257 = vpow2.f32 %v1014_v24 }
  0xc0   : > { %1259 = vpow2.f32 %v1015_v25  ;;  %v453_v25 = vunpack.c.h.bf16 %v449_v17 }
  0xc2   : > { %v319_v28 = vpop.f32.mrf.mxu0 }
  0xc3   : > { %v356_v27 = vpop.f32.mrf.mxu3  ;;  %v332_v30 = vpop.f32.mrf.mxu1 }
  0xc4   : > { %v363_v29 = vadd.f32 %v356_v27, %v114_v26 }
  0xc5   : > { %v1258_v32 = vpop.eup %1257 }
  0xc6   : > { %v1016_v33 = vmul.f32 -1.442695, %v363_v29  ;;  %v1260_v34 = vpop.eup %1259  ;;  %v367_v36 = vadd.f32 1.0, %v1258_v32 }
  0xc7   : > { %v386_v37 = vadd.f32 1.0, %v1260_v34 }
  0xc8   : > { %v343_v31 = vpop.f32.mrf.mxu2  ;;  %1261 = vpow2.f32 %v1016_v33  ;;  %v379_v48 = vand.u32 2147483648, %v367_v36  ;;  %vm373_vm2 = vweird.f32 %v367_v36  ;;  %v377_v50 = vand.u32 2147483647, %v367_v36 }
  0xc9   : > { %1263 = vrcp.f32 %v367_v36  ;;  %v362_v40 = vadd.f32 %v343_v31, %v113_v38  ;;  %vm392_vm4 = vweird.f32 %v386_v37  ;;  %v398_v53 = vand.u32 2147483648, %v386_v37 }
  0xca   : > { %1265 = vrcp.f32 %v386_v37  ;;  %v396_v55 = vand.u32 2147483647, %v386_v37  ;;  %v380_v57 = vor.u32 1.1754944e-38, %v379_v48  ;;  %vm378_vm7 = vcmp.eq.f32.partialorder %v377_v50, 8.507059e+37 }
  0xcb   : > { %v358_v39 = vpop.f32.mrf.mxu3  ;;  %1267 = vtanh.f32 %v362_v40  ;;  %v399_v3 = vor.u32 1.1754944e-38, %v398_v53 }
  0xcc   : > { %vm397_vm9 = vcmp.eq.f32.partialorder %v396_v55, 8.507059e+37 }
  0xce   : > { %v1262_v42 = vpop.eup %1261 }
  0xcf   : > { %v1264_v43 = vpop.eup %1263  ;;  %v1607_v44 = vadd.f32 1.0, %v1262_v42 }
  0xd0   : > { %v345_v41 = vpop.f32.mrf.mxu2  ;;  %v1266_v45 = vpop.eup %1265  ;;  %v369_v46 = vmul.f32 %v1264_v43, %v367_v36  ;;  %vm374_vm3 = vweird.f32 %v1264_v43 }
  0xd1   : > { %v388_v47 = vmul.f32 %v1266_v45, %v386_v37  ;;  %1269 = vrcp.f32 %v1607_v44  ;;  %vm393_vm5 = vweird.f32 %v1266_v45  ;;  %vm1615_vm6 = vmor %vm373_vm2, %vm374_vm3  ;;  %v1268_v59 = vpop.eup %1267  ;;  %vm412_vm10 = vweird.f32 %v1607_v44 }
  0xd2   : > { %v370_v49 = vsub.f32 1.0, %v369_v46  ;;  %vm1619_vm8 = vmor %vm392_vm4, %vm393_vm5  ;;  %v418_v19 = vand.u32 2147483648, %v1607_v44  ;;  %v416_v24 = vand.u32 2147483647, %v1607_v44  ;;  %v452_v46 = vunpack.c.l.bf16 %v449_v17 }
  0xd3   : > { %v389_v51 = vsub.f32 1.0, %v388_v47 }
  0xd4   : > { %v371_v54 = vmul.f32 %v1264_v43, %v370_v49  ;;  %v419_v29 = vor.u32 1.1754944e-38, %v418_v19  ;;  %vm417_vm14 = vcmp.eq.f32.partialorder %v416_v24, 8.507059e+37 }
  0xd5   : > { %v390_v58 = vmul.f32 %v1266_v45, %v389_v51 }
  0xd6   : > { %v372_v60 = vadd.f32 %v1264_v43, %v371_v54 }
  0xd7   : > { %v1270_v0 = vpop.eup %1269  ;;  %v391_v2 = vadd.f32 %v1266_v45, %v390_v58 }
  0xd8   : > { %v408_v4 = vmul.f32 %v1270_v0, %v1607_v44  ;;  %v376_v5 = vsel %vm1615_vm6, %v1264_v43, %v372_v60  ;;  %vm413_vm11 = vweird.f32 %v1270_v0 }
  0xd9   : > { %v381_v6 = vsel %vm378_vm7, %v380_v57, %v376_v5  ;;  %v395_v11 = vsel %vm1619_vm8, %v1266_v45, %v391_v2  ;;  %vm1632_vm13 = vmor %vm412_vm10, %vm413_vm11 }
  0xda   : > { %v656_v7 = vpop.f32.mrf.mxu0  ;;  %v409_v12 = vsub.f32 1.0, %v408_v4  ;;  %v423_v13 = vmul.f32 %v1268_v59, %v381_v6  ;;  %v400_v18 = vsel %vm397_vm9, %v399_v3, %v395_v11 }
  0xdb   : > { %v669_v8 = vpop.f32.mrf.mxu1  ;;  %v699_v14 = vadd.f32 %v656_v7, %v450_v61  ;;  %v422_v23 = vmul.f32 %v400_v18, %v105_v9 }
  0xdc   : > { %v700_v15 = vadd.f32 %v669_v8, %v451_v62  ;;  %v410_v22 = vmul.f32 %v1270_v0, %v409_v12 }
  0xdd   : > { %v1149_v20 = vmul.f32 -1.442695, %v699_v14  ;;  %v424_v28 = vadd.f32 %v423_v13, %v422_v23  ;;  %v771_v13 = vpop.permute.xlu0 %770 }
  0xde   : > { %v1150_v21 = vmul.f32 -1.442695, %v700_v15  ;;  %v411_v26 = vadd.f32 %v1270_v0, %v410_v22  ;;  %vm772_vm7 = vcmp.eq.s32.totalorder %v771_v13, 1 }
  0xdf   : > { %1271 = vpow2.f32 %v1149_v20  ;;  %v436_v30 = vsel %vm433_vm12, %v424_v28, %v105_v9  ;;  %v444_v9 = vld [vmem:[#allocation5] sm:$0xff] }
  0xe0   : > { %1273 = vpow2.f32 %v1150_v21  ;;  %v415_v32 = vsel %vm1632_vm13, %v1270_v0, %v411_v26  ;;  %437 = vst [vmem:[#allocation3] sm:$0xff] %v436_v30 }
  0xe1   : > { %1275 = vtanh.f32 %v424_v28  ;;  %v695_v31 = vpop.f32.mrf.mxu3  ;;  %v420_v40 = vsel %vm417_vm14, %v419_v29, %v415_v32 }
  0xe2   : > { %v702_v33 = vadd.f32 %v695_v31, %v453_v25  ;;  %v658_v34 = vpop.f32.mrf.mxu0 }
  0xe3   : > { %v671_v36 = vpop.f32.mrf.mxu1 }
  0xe4   : > { %v1151_v37 = vmul.f32 -1.442695, %v702_v33 }
  0xe5   : > { %v1272_v39 = vpop.eup %1271 }
  0xe6   : > { %v682_v38 = vpop.f32.mrf.mxu2  ;;  %v1274_v41 = vpop.eup %1273  ;;  %v706_v42 = vadd.f32 1.0, %v1272_v39  ;;  %1277 = vpow2.f32 %v1151_v37 }
  0xe7   : > { %v1276_v43 = vpop.eup %1275  ;;  %v725_v44 = vadd.f32 1.0, %v1274_v41  ;;  %v701_v51 = vadd.f32 %v682_v38, %v452_v46 }
  0xe8   : > { %1279 = vrcp.f32 %v706_v42  ;;  %v426_v45 = vmul.f32 %v1276_v43, %v420_v40  ;;  %v718_v60 = vand.u32 2147483648, %v706_v42  ;;  %v716_v61 = vand.u32 2147483647, %v706_v42 }
  0xe9   : > { %1281 = vrcp.f32 %v725_v44  ;;  %v697_v47 = vpop.f32.mrf.mxu3  ;;  %v737_v62 = vand.u32 2147483648, %v725_v44  ;;  %v735_v0 = vand.u32 2147483647, %v725_v44  ;;  %vm712_vm1 = vweird.f32 %v706_v42 }
  0xea   : > { %v434_v48 = vsel %vm433_vm12, %v426_v45, %v1579_v35  ;;  %v438_v49 = vsel %vm433_vm12, %v426_v45, 0.0  ;;  %v719_v6 = vor.u32 1.1754944e-38, %v718_v60  ;;  %vm731_vm3 = vweird.f32 %v725_v44 }
  0xeb   : > { %435 = vst [vmem:[#allocation2] sm:$0xff] %v434_v48  ;;  %vm717_vm4 = vcmp.eq.f32.partialorder %v716_v61, 8.507059e+37  ;;  %v738_v11 = vor.u32 1.1754944e-38, %v737_v62  ;;  %vm736_vm6 = vcmp.eq.f32.partialorder %v735_v0, 8.507059e+37 }
  0xec   : > { %v1278_v50 = vpop.eup %1277  ;;  %442 = vst [vmem:[%s441_s15] sm:$0xff] %v438_v49 }
  0xed   : > { %v745_v53 = vadd.f32 1.0, %v1278_v50 }
  0xee   : > { %v684_v52 = vpop.f32.mrf.mxu2  ;;  %v1280_v54 = vpop.eup %1279 }
  0xef   : > { %v1282_v55 = vpop.eup %1281  ;;  %v708_v56 = vmul.f32 %v1280_v54, %v706_v42  ;;  %1283 = vrcp.f32 %v745_v53  ;;  %vm713_vm15 = vweird.f32 %v1280_v54  ;;  %v757_v22 = vand.u32 2147483648, %v745_v53 }
  0xf0   : > { %v727_v57 = vmul.f32 %v1282_v55, %v725_v44  ;;  %1285 = vtanh.f32 %v701_v51  ;;  %vm732_vm0 = vweird.f32 %v1282_v55  ;;  %vm714_vm2 = vmor %vm712_vm1, %vm713_vm15  ;;  %vm751_vm9 = vweird.f32 %v745_v53 }
  0xf1   : > { %v709_v58 = vsub.f32 1.0, %v708_v56  ;;  %vm733_vm5 = vmor %vm731_vm3, %vm732_vm0  ;;  %v755_v24 = vand.u32 2147483647, %v745_v53  ;;  %v758_v26 = vor.u32 1.1754944e-38, %v757_v22 }
  0xf2   : > { %v728_v59 = vsub.f32 1.0, %v727_v57 }
  0xf3   : > { %v710_v35 = vmul.f32 %v1280_v54, %v709_v58  ;;  %vm756_vm11 = vcmp.eq.f32.partialorder %v755_v24, 8.507059e+37 }
  0xf4   : > { %v729_v63 = vmul.f32 %v1282_v55, %v728_v59 }
  0xf5   : > { %v1284_v2 = vpop.eup %1283  ;;  %v711_v3 = vadd.f32 %v1280_v54, %v710_v35 }
  0xf6   : > { %v1286_v4 = vpop.eup %1285  ;;  %v747_v5 = vmul.f32 %v1284_v2, %v745_v53  ;;  %v730_v7 = vadd.f32 %v1282_v55, %v729_v63  ;;  %vm752_vm8 = vweird.f32 %v1284_v2 }
  0xf7   : > { %v715_v8 = vsel %vm714_vm2, %v1280_v54, %v711_v3  ;;  %vm753_vm10 = vmor %vm751_vm9, %vm752_vm8 }
  0xf8   : > { %v720_v12 = vsel %vm717_vm4, %v719_v6, %v715_v8  ;;  %v734_v14 = vsel %vm733_vm5, %v1282_v55, %v730_v7  ;;  %v748_v15 = vsub.f32 1.0, %v747_v5 }
  0xf9   : > { %v762_v16 = vmul.f32 %v1286_v4, %v720_v12  ;;  %v739_v17 = vsel %vm736_vm6, %v738_v11, %v734_v14 }
  0xfa   : > { %v749_v18 = vmul.f32 %v1284_v2, %v748_v15  ;;  %v761_v19 = vmul.f32 %v739_v17, %v444_v9 }
  0xfc   : > { %v763_v20 = vadd.f32 %v762_v16, %v761_v19  ;;  %v750_v21 = vadd.f32 %v1284_v2, %v749_v18 }
  0xfe   : > { %1287 = vtanh.f32 %v763_v20  ;;  %v775_v23 = vsel %vm772_vm7, %v763_v20, %v444_v9  ;;  %v754_v25 = vsel %vm753_vm10, %v1284_v2, %v750_v21 }
  0xff   : > { %776 = vst [vmem:[#allocation5] sm:$0xff] %v775_v23  ;;  %v759_v28 = vsel %vm756_vm11, %v758_v26, %v754_v25 }
 0x104   : > { %v1288_v27 = vpop.eup %1287 }
 0x105   : > { %v765_v29 = vmul.f32 %v1288_v27, %v759_v28  ;;  %101 = sbr.rel (!%p98_p1) target bundleno = 27 (0x1b), region = 93 }
 0x107   : > { %v773_v30 = vsel %vm772_vm7, %v765_v29, %v1599_v10  ;;  %v777_v31 = vsel %vm772_vm7, %v765_v29, 0.0 }
 0x108   : > { %774 = vst [vmem:[#allocation4] sm:$0xff] %v773_v30 }
 0x109   : > { %781 = vst [vmem:[%s780_s16 + $0x8] sm:$0xff] %v777_v31 }
 0x10a PF:  { %s782_s19 = ssub.s32 8, %s1674_s0 }
 0x10b   :  { %p1154_p2 = scmp.le.s32.totalorder %s782_s19, 0 }
 0x10c   :  { %s1479_s20 = smov (!%p1154_p2), 0  }
 0x10d   :  { %879 = sbr.rel (%p1154_p2) target bundleno = 282 (0x11a), region = 98 }
 0x112 LB: > { %s789_s23 = sadd.s32 %s1481_s20, %s1674_s0  ;;  %v1491_v10 = vmov 0.0   ;;  %s786_s20 = sadd.s32 1, %s1481_s20   ;;  %s1481_s20 = sphi %s1479_s20, %s786_s20  }
 0x113   : > { %s1225_s4 = sshll.u32 %s789_s23, 4  ;;  %p785_p3 = scmp.ge.s32.totalorder %s786_s20, %s782_s19 }
 0x114   : > { %s792_s5 = scalar_lea.vmem [#allocation16], %s1225_s4 }
 0x115   : > { %793 = vst [vmem:[%s792_s5] sm:$0xff] %v1491_v10  ;;  %788 = sbr.rel (!%p785_p3) target bundleno = 274 (0x112), region = 104 }
 0x116   : > { %794 = vst [vmem:[%s792_s5 + $0x8] sm:$0xff] %v1491_v10 }
 0x11a PF:  { %v795_v1 = vld [vmem:[#allocation2] sm:$0xff]  ;;  %v797_v32 = vld [vmem:[#allocation4] sm:$0xff]  ;;  %v800_v33 = vld [vmem:[#allocation3] sm:$0xff]  ;;  %s824_s26 = sshll.u32 %s1681_s7, 4  ;;  %s1492_s27 = smov [#allocation17]   ;;  %s825_s26 = int_to_ptr.hbm [resolvable:$true] %s824_s26 }
 0x11b   :  { %796 = vst [vmem:[#allocation17] sm:$0xff] %v795_v1  ;;  %v802_v34 = vld [vmem:[#allocation5] sm:$0xff]  ;;  %s822_s1 = sshll.u32 %s1492_s27, 4  ;;  %s1493_s28 = smov 128   ;;  %s823_s1 = int_to_ptr.vmem [resolvable:$true] %s822_s1 }
 0x11c   :  { %799 = vst [vmem:[#allocation17 + $0x8] sm:$0xff] %v797_v32  ;;  %s1494_s29 = smov 8   ;;  %s1495_s0 = smov [#allocation16]  }
 0x11d   :  { %801 = vst [vmem:[#allocation19] sm:$0xff] %v800_v33  ;;  %830 = dma.vmem_to_hbm [thread:$0]  %s823_s1, 256, %s825_s26, [#allocation18], %s1493_s28, %s1493_s28, %s1494_s29  }
 0x11e   :  { %804 = vst [vmem:[#allocation19 + $0x8] sm:$0xff] %v802_v34  ;;  %s809_s30 = sshll.u32 %s1495_s0, 4  ;;  %s811_s11 = sshll.u32 %s1680_s6, 4  ;;  %s810_s30 = int_to_ptr.vmem [resolvable:$true] %s809_s30  ;;  %s812_s11 = int_to_ptr.hbm [resolvable:$true] %s811_s11 }
 0x11f   :  { %817 = dma.vmem_to_hbm [thread:$0]  %s810_s30, 2048, %s812_s11, [#allocation10], %s1484_s13, %s1484_s13, %s1485_s14  }
 0x120   :  { %s837_s15 = sshll.u32 %s1682_s8, 4  ;;  %s1496_s16 = smov [#allocation19]   ;;  %s838_s15 = int_to_ptr.hbm [resolvable:$true] %s837_s15 }
 0x121   :  { %s835_s17 = sshll.u32 %s1496_s16, 4  ;;  %s836_s17 = int_to_ptr.vmem [resolvable:$true] %s835_s17 }
 0x122   :  { %843 = dma.vmem_to_hbm [thread:$0]  %s836_s17, 256, %s838_s15, [#allocation18], %s1493_s28, %s1493_s28, %s1494_s29  }
 0x123   :  { %1471 = dma.done.wait [#allocation10], 2048  }
 0x124   :  { %1472 = vsyncadd [#allocation10], 4294965248 }
 0x125   :  { %1473 = dma.done.wait [#allocation18], 512  }
 0x126   :  { %1474 = vsyncadd [#allocation18], 4294966784 }
 0x127   :  { %856 = vsyncpa [#allocation9], 1 }
 0x128   :  { %857 = vsyncpa [#allocation12], 1 }
 0x129   :  { %858 = vsyncpa [#allocation15], 1 }
 0x12a   :  { %859 = vsyncpa [#allocation10], 1 }
 0x12b   :  { %860 = vsyncpa [#allocation18], 1 }

</bundles_post_ra>
